<compile_context>
chip_gen: v7x
topology: tpu7x:2x2x1
jax: 0.10.0
libtpu: 0.0.40
codegen_flags: <defaults>
</compile_context>

<pallas_src>
import math
import functools

import jax
import jax.numpy as jnp
from jax.experimental import pallas as pl
from jax.experimental.pallas import tpu as pltpu

NUM_BUCKETS = 32
MAX_DISTANCE = 128
N_HEADS = 2


def _round_up(x, m):
    return (x + m - 1) // m * m


def _rel_pos_bias_kernel(w_ref, out_ref, *, num_buckets, max_distance,
                         n_heads, tq, tk):
    """w_ref: (num_buckets * n_heads,) f32 in SMEM (bucket-major).
       out_ref: (n_heads, tq, tk) f32 block in VMEM."""
    i = pl.program_id(0)
    j = pl.program_id(1)
    q0 = i * tq
    k0 = j * tk

    nb = num_buckets // 2
    max_exact = nb // 2

    # n = q_i - k_j (== -relative_position).  Range of n over this tile:
    n_min = q0 - (k0 + (tk - 1))
    n_max = (q0 + (tq - 1)) - k0
    all_pos_sat = n_min >= max_distance      # whole tile -> bucket nb - 1
    all_neg_sat = n_max <= -max_distance     # whole tile -> bucket num_buckets - 1
    is_const = jnp.logical_or(all_pos_sat, all_neg_sat)

    @pl.when(is_const)
    def _():
        # Far-from-diagonal tile: a single saturated bucket -> broadcast + store.
        b_const = jnp.where(all_pos_sat, nb - 1, num_buckets - 1)
        for h in range(n_heads):
            w_bh = w_ref[b_const * n_heads + h]      # dynamic scalar SMEM read
            out_ref[h, :, :] = jnp.full((tq, tk), w_bh, jnp.float32)

    @pl.when(jnp.logical_not(is_const))
    def _():
        qi = q0 + jax.lax.broadcasted_iota(jnp.int32, (tq, tk), 0)
        kj = k0 + jax.lax.broadcasted_iota(jnp.int32, (tq, tk), 1)
        n = qi - kj                                  # = q_i - k_j

        ret = jnp.where(n < 0, jnp.int32(nb), jnp.int32(0))
        n_abs = jnp.abs(n)
        is_small = n_abs < max_exact

        # Guard the log for the small branch (those lanes are masked by the
        # jnp.where below, exactly like the torch.where in the reference).
        n_safe = jnp.maximum(n_abs, max_exact).astype(jnp.float32)
        log_ratio = jnp.log(n_safe / float(max_exact)) / math.log(max_distance / max_exact)
        # torch .long() truncates toward zero; log_ratio >= 0 here so astype matches.
        val_if_large = max_exact + (log_ratio * (nb - max_exact)).astype(jnp.int32)
        val_if_large = jnp.minimum(val_if_large, jnp.int32(nb - 1))

        bucket = ret + jnp.where(is_small, n_abs, val_if_large)

        # Embedding lookup: Mosaic has no generic dynamic gather, so the tiny
        # (num_buckets x n_heads) table is applied via select-accumulate.
        # The bucket compare is hoisted out of the head loop (mask reuse).
        accs = [jnp.zeros((tq, tk), jnp.float32) for _ in range(n_heads)]
        for b in range(num_buckets):
            mask = bucket == b
            for h in range(n_heads):
                accs[h] = jnp.where(mask, w_ref[b * n_heads + h], accs[h])
        for h in range(n_heads):
            out_ref[h, :, :] = accs[h]


def relative_position_bias(weight, qlen, klen,
                           num_buckets=NUM_BUCKETS,
                           max_distance=MAX_DISTANCE,
                           tq=512, tk=1024):
    """weight: (num_buckets, n_heads) f32. Returns (1, n_heads, qlen, klen) f32."""
    n_heads = weight.shape[1]

    # Tile sizes: sublane-aligned TQ (multiple of 8), lane-dense TK (multiple
    # of 128).  Pad the output grid and slice afterwards so every store is an
    # unmasked full-lane vst.
    tq = max(8, min(tq, _round_up(qlen, 8)))
    tk = max(128, min(tk, _round_up(klen, 128)))
    qpad = _round_up(qlen, tq)
    kpad = _round_up(klen, tk)
    grid = (qpad // tq, kpad // tk)

    kernel = functools.partial(
        _rel_pos_bias_kernel,
        num_buckets=num_buckets, max_distance=max_distance,
        n_heads=n_heads, tq=tq, tk=tk)

    w_flat = weight.astype(jnp.float32).reshape(-1)  # (num_buckets*n_heads,), bucket-major

    out = pl.pallas_call(
        kernel,
        out_shape=jax.ShapeDtypeStruct((n_heads, qpad, kpad), jnp.float32),
        grid=grid,
        in_specs=[pl.BlockSpec(memory_space=pltpu.MemorySpace.SMEM)],
        out_specs=pl.BlockSpec((n_heads, tq, tk), lambda i, j: (0, i, j)),
        compiler_params=pltpu.CompilerParams(
            dimension_semantics=("parallel", "parallel")),
    )(w_flat)

    out = out[:, :qlen, :klen]
    return out[None]  # unsqueeze(0) -> (1, n_heads, qlen, klen)


def _reference_jax(weight, qlen, klen, num_buckets=NUM_BUCKETS, max_distance=MAX_DISTANCE):
    """Pure-JAX port of the PyTorch module, used only as a correctness check."""
    q_pos = jnp.arange(qlen, dtype=jnp.int32)
    k_pos = jnp.arange(klen, dtype=jnp.int32)
    relative_position = k_pos[None, :] - q_pos[:, None]
    n = -relative_position
    nb = num_buckets // 2
    ret = jnp.where(n < 0, nb, 0)
    n = jnp.abs(n)
    max_exact = nb // 2
    is_small = n < max_exact
    n_safe = jnp.maximum(n, max_exact).astype(jnp.float32)
    val_if_large = max_exact + (
        jnp.log(n_safe / max_exact) / math.log(max_distance / max_exact) * (nb - max_exact)
    ).astype(jnp.int32)
    val_if_large = jnp.minimum(val_if_large, nb - 1)
    rp_bucket = ret + jnp.where(is_small, n, val_if_large)
    values = weight[rp_bucket]                     # (qlen, klen, n_heads)
    return jnp.transpose(values, (2, 0, 1))[None]  # (1, n_heads, qlen, klen)


if __name__ == "__main__":
    key = jax.random.PRNGKey(0)
    # nn.Embedding(num_buckets, n_heads).weight ~ N(0, 1)
    weight = jax.random.normal(key, (NUM_BUCKETS, N_HEADS), dtype=jnp.float32)

    # --- Test 1: small shapes, strict comparison (single tile). ---
    qlen, klen = 8, 16
    out = jax.block_until_ready(relative_position_bias(weight, qlen, klen))
    assert out.shape == (1, N_HEADS, qlen, klen), out.shape
    ref = jax.block_until_ready(_reference_jax(weight, qlen, klen))
    assert jnp.allclose(out, ref, atol=1e-6), "mismatch vs. pure-JAX reference (small case)"

    # --- Test 2: multi-tile grid + constant-fill fast path (tiles beyond
    #     max_distance), with explicit small tiles to exercise the grid. ---
    qlen2, klen2 = 300, 640
    out2 = jax.block_until_ready(
        relative_position_bias(weight, qlen2, klen2, tq=64, tk=256))
    assert out2.shape == (1, N_HEADS, qlen2, klen2), out2.shape
    ref2 = jax.block_until_ready(_reference_jax(weight, qlen2, klen2))

    # |q - k| in {16, 32, 64} sit exactly on f32 log bucket boundaries; the
    # kernel's EUP log and XLA's log lowering may round the last ulp
    # differently there, flipping the bucket by one (same documented 1-ulp
    # ambiguity as torch-vs-jax).  Exclude those few diagonals from the
    # strict check; everything else must match exactly.
    dist = jnp.abs(jnp.arange(klen2)[None, :] - jnp.arange(qlen2)[:, None])
    ambiguous = (dist == 16) | (dist == 32) | (dist == 64)
    ok = jnp.isclose(out2, ref2, atol=1e-6, rtol=0.0) | ambiguous[None, None, :, :]
    assert bool(jnp.all(ok)), "mismatch vs. pure-JAX reference (large case)"

    print("KERNEL_OK")
</pallas_src>

<mosaic_0001>
module attributes {stable_mosaic.version = 11 : i64} {
  func.func @_rel_pos_bias_kernel(%arg0: i32, %arg1: i32, %arg2: memref<64xf32, #tpu.memory_space<smem>>, %arg3: memref<2x8x128xf32, #tpu.memory_space<vmem>>) attributes {dimension_semantics = [#tpu.dimension_semantics<parallel>, #tpu.dimension_semantics<parallel>], iteration_bounds = array<i64: 1, 1>, scalar_prefetch = 0 : i64, scratch_operands = 0 : i64, tpu.core_type = #tpu.core_type<tc>, window_params = [{transform_indices = @transform_0, window_bounds = array<i64: 64>}, {transform_indices = @transform_1, window_bounds = array<i64: 2, 8, 128>}]} {
    %c8_i32 = arith.constant 8 : i32
    %0 = arith.muli %arg0, %c8_i32 : i32
    %c128_i32 = arith.constant 128 : i32
    %1 = arith.muli %arg1, %c128_i32 : i32
    %c127_i32 = arith.constant 127 : i32
    %2 = arith.addi %1, %c127_i32 : i32
    %3 = arith.subi %0, %2 : i32
    %c7_i32 = arith.constant 7 : i32
    %4 = arith.addi %0, %c7_i32 : i32
    %5 = arith.subi %4, %1 : i32
    %c128_i32_0 = arith.constant 128 : i32
    %6 = arith.cmpi sge, %3, %c128_i32_0 : i32
    %c-128_i32 = arith.constant -128 : i32
    %7 = arith.cmpi sle, %5, %c-128_i32 : i32
    %8 = arith.ori %6, %7 : i1
    %9 = arith.extui %8 : i1 to i32
    %c0_i32 = arith.constant 0 : i32
    %10 = arith.cmpi ne, %9, %c0_i32 : i32
    scf.if %10 {
      %c15_i32 = arith.constant 15 : i32
      %c31_i32 = arith.constant 31 : i32
      %14 = arith.select %6, %c15_i32, %c31_i32 : i32
      %c2_i32 = arith.constant 2 : i32
      %15 = arith.muli %14, %c2_i32 : i32
      %c0_i32_2 = arith.constant 0 : i32
      %16 = arith.addi %15, %c0_i32_2 : i32
      %17 = arith.index_cast %16 : i32 to index
      %18 = memref.load %arg2[%17] : memref<64xf32, #tpu.memory_space<smem>>
      %19 = vector.broadcast %18 : f32 to vector<8x128xf32>
      %c0 = arith.constant 0 : index
      %c0_3 = arith.constant 0 : index
      %c0_4 = arith.constant 0 : index
      %20 = vector.load %arg3[%c0, %c0_3, %c0_4] : memref<2x8x128xf32, #tpu.memory_space<vmem>>, vector<1x8x128xf32>
      %21 = vector.shape_cast %20 : vector<1x8x128xf32> to vector<8x128xf32>
      %22 = vector.shape_cast %19 : vector<8x128xf32> to vector<1x8x128xf32>
      tpu.vector_store %arg3[%c0, %c0_3, %c0_4], %22 {strides = array<i32>} : memref<2x8x128xf32, #tpu.memory_space<vmem>>, vector<1x8x128xf32>,
      %c2_i32_5 = arith.constant 2 : i32
      %23 = arith.muli %14, %c2_i32_5 : i32
      %c1_i32 = arith.constant 1 : i32
      %24 = arith.addi %23, %c1_i32 : i32
      %25 = arith.index_cast %24 : i32 to index
      %26 = memref.load %arg2[%25] : memref<64xf32, #tpu.memory_space<smem>>
      %27 = vector.broadcast %26 : f32 to vector<8x128xf32>
      %c1 = arith.constant 1 : index
      %c0_6 = arith.constant 0 : index
      %c0_7 = arith.constant 0 : index
      %28 = vector.load %arg3[%c1, %c0_6, %c0_7] : memref<2x8x128xf32, #tpu.memory_space<vmem>>, vector<1x8x128xf32>
      %29 = vector.shape_cast %28 : vector<1x8x128xf32> to vector<8x128xf32>
      %30 = vector.shape_cast %27 : vector<8x128xf32> to vector<1x8x128xf32>
      tpu.vector_store %arg3[%c1, %c0_6, %c0_7], %30 {strides = array<i32>} : memref<2x8x128xf32, #tpu.memory_space<vmem>>, vector<1x8x128xf32>,
    } else {
    }
    %true = arith.constant true
    %11 = arith.xori %8, %true : i1
    %12 = arith.extui %11 : i1 to i32
    %c0_i32_1 = arith.constant 0 : i32
    %13 = arith.cmpi ne, %12, %c0_i32_1 : i32
    scf.if %13 {
      %14 = tpu.iota {dimensions = array<i32: 0>} : vector<8x128xi32>
      %15 = vector.broadcast %0 : i32 to vector<8x128xi32>
      %16 = arith.addi %15, %14 : vector<8x128xi32>
      %17 = tpu.iota {dimensions = array<i32: 1>} : vector<8x128xi32>
      %18 = vector.broadcast %1 : i32 to vector<8x128xi32>
      %19 = arith.addi %18, %17 : vector<8x128xi32>
      %20 = arith.subi %16, %19 : vector<8x128xi32>
      %c0_i32_2 = arith.constant 0 : i32
      %21 = vector.broadcast %c0_i32_2 : i32 to vector<8x128xi32>
      %22 = arith.cmpi slt, %20, %21 : vector<8x128xi32>
      %c16_i32 = arith.constant 16 : i32
      %c0_i32_3 = arith.constant 0 : i32
      %23 = vector.broadcast %c16_i32 : i32 to vector<8x128xi32>
      %24 = vector.broadcast %c0_i32_3 : i32 to vector<8x128xi32>
      %25 = arith.select %22, %23, %24 : vector<8x128xi1>, vector<8x128xi32>
      %26 = math.absi %20 : vector<8x128xi32>
      %c8_i32_4 = arith.constant 8 : i32
      %27 = vector.broadcast %c8_i32_4 : i32 to vector<8x128xi32>
      %28 = arith.cmpi slt, %26, %27 : vector<8x128xi32>
      %c8_i32_5 = arith.constant 8 : i32
      %29 = vector.broadcast %c8_i32_5 : i32 to vector<8x128xi32>
      %30 = arith.maxsi %26, %29 : vector<8x128xi32>
      %31 = arith.sitofp %30 : vector<8x128xi32> to vector<8x128xf32>
      %cst = arith.constant 8.000000e+00 : f32
      %32 = vector.broadcast %cst : f32 to vector<8x128xf32>
      %33 = arith.divf %31, %32 : vector<8x128xf32>
      %34 = math.log %33 : vector<8x128xf32>
      %cst_6 = arith.constant 2.77258873 : f32
      %35 = vector.broadcast %cst_6 : f32 to vector<8x128xf32>
      %36 = arith.divf %34, %35 : vector<8x128xf32>
      %cst_7 = arith.constant 8.000000e+00 : f32
      %37 = vector.broadcast %cst_7 : f32 to vector<8x128xf32>
      %38 = arith.mulf %36, %37 : vector<8x128xf32>
      %39 = arith.fptosi %38 : vector<8x128xf32> to vector<8x128xi32>
      %c8_i32_8 = arith.constant 8 : i32
      %40 = vector.broadcast %c8_i32_8 : i32 to vector<8x128xi32>
      %41 = arith.addi %40, %39 : vector<8x128xi32>
      %c15_i32 = arith.constant 15 : i32
      %42 = vector.broadcast %c15_i32 : i32 to vector<8x128xi32>
      %43 = arith.minsi %41, %42 : vector<8x128xi32>
      %44 = arith.select %28, %26, %43 : vector<8x128xi1>, vector<8x128xi32>
      %45 = arith.addi %25, %44 : vector<8x128xi32>
      %cst_9 = arith.constant 0.000000e+00 : f32
      %46 = vector.broadcast %cst_9 : f32 to vector<8x128xf32>
      %cst_10 = arith.constant 0.000000e+00 : f32
      %47 = vector.broadcast %cst_10 : f32 to vector<8x128xf32>
      %c0_i32_11 = arith.constant 0 : i32
      %48 = vector.broadcast %c0_i32_11 : i32 to vector<8x128xi32>
      %49 = arith.cmpi eq, %45, %48 : vector<8x128xi32>
      %c0 = arith.constant 0 : index
      %50 = memref.load %arg2[%c0] : memref<64xf32, #tpu.memory_space<smem>>
      %51 = vector.broadcast %50 : f32 to vector<8x128xf32>
      %52 = arith.select %49, %51, %46 : vector<8x128xi1>, vector<8x128xf32>
      %c1 = arith.constant 1 : index
      %53 = memref.load %arg2[%c1] : memref<64xf32, #tpu.memory_space<smem>>
      %54 = vector.broadcast %53 : f32 to vector<8x128xf32>
      %55 = arith.select %49, %54, %47 : vector<8x128xi1>, vector<8x128xf32>
      %c1_i32 = arith.constant 1 : i32
      %56 = vector.broadcast %c1_i32 : i32 to vector<8x128xi32>
      %57 = arith.cmpi eq, %45, %56 : vector<8x128xi32>
      %c2 = arith.constant 2 : index
      %58 = memref.load %arg2[%c2] : memref<64xf32, #tpu.memory_space<smem>>
      %59 = vector.broadcast %58 : f32 to vector<8x128xf32>
      %60 = arith.select %57, %59, %52 : vector<8x128xi1>, vector<8x128xf32>
      %c3 = arith.constant 3 : index
      %61 = memref.load %arg2[%c3] : memref<64xf32, #tpu.memory_space<smem>>
      %62 = vector.broadcast %61 : f32 to vector<8x128xf32>
      %63 = arith.select %57, %62, %55 : vector<8x128xi1>, vector<8x128xf32>
      %c2_i32 = arith.constant 2 : i32
      %64 = vector.broadcast %c2_i32 : i32 to vector<8x128xi32>
      %65 = arith.cmpi eq, %45, %64 : vector<8x128xi32>
      %c4 = arith.constant 4 : index
      %66 = memref.load %arg2[%c4] : memref<64xf32, #tpu.memory_space<smem>>
      %67 = vector.broadcast %66 : f32 to vector<8x128xf32>
      %68 = arith.select %65, %67, %60 : vector<8x128xi1>, vector<8x128xf32>
      %c5 = arith.constant 5 : index
      %69 = memref.load %arg2[%c5] : memref<64xf32, #tpu.memory_space<smem>>
      %70 = vector.broadcast %69 : f32 to vector<8x128xf32>
      %71 = arith.select %65, %70, %63 : vector<8x128xi1>, vector<8x128xf32>
      %c3_i32 = arith.constant 3 : i32
      %72 = vector.broadcast %c3_i32 : i32 to vector<8x128xi32>
      %73 = arith.cmpi eq, %45, %72 : vector<8x128xi32>
      %c6 = arith.constant 6 : index
      %74 = memref.load %arg2[%c6] : memref<64xf32, #tpu.memory_space<smem>>
      %75 = vector.broadcast %74 : f32 to vector<8x128xf32>
      %76 = arith.select %73, %75, %68 : vector<8x128xi1>, vector<8x128xf32>
      %c7 = arith.constant 7 : index
      %77 = memref.load %arg2[%c7] : memref<64xf32, #tpu.memory_space<smem>>
      %78 = vector.broadcast %77 : f32 to vector<8x128xf32>
      %79 = arith.select %73, %78, %71 : vector<8x128xi1>, vector<8x128xf32>
      %c4_i32 = arith.constant 4 : i32
      %80 = vector.broadcast %c4_i32 : i32 to vector<8x128xi32>
      %81 = arith.cmpi eq, %45, %80 : vector<8x128xi32>
      %c8 = arith.constant 8 : index
      %82 = memref.load %arg2[%c8] : memref<64xf32, #tpu.memory_space<smem>>
      %83 = vector.broadcast %82 : f32 to vector<8x128xf32>
      %84 = arith.select %81, %83, %76 : vector<8x128xi1>, vector<8x128xf32>
      %c9 = arith.constant 9 : index
      %85 = memref.load %arg2[%c9] : memref<64xf32, #tpu.memory_space<smem>>
      %86 = vector.broadcast %85 : f32 to vector<8x128xf32>
      %87 = arith.select %81, %86, %79 : vector<8x128xi1>, vector<8x128xf32>
      %c5_i32 = arith.constant 5 : i32
      %88 = vector.broadcast %c5_i32 : i32 to vector<8x128xi32>
      %89 = arith.cmpi eq, %45, %88 : vector<8x128xi32>
      %c10 = arith.constant 10 : index
      %90 = memref.load %arg2[%c10] : memref<64xf32, #tpu.memory_space<smem>>
      %91 = vector.broadcast %90 : f32 to vector<8x128xf32>
      %92 = arith.select %89, %91, %84 : vector<8x128xi1>, vector<8x128xf32>
      %c11 = arith.constant 11 : index
      %93 = memref.load %arg2[%c11] : memref<64xf32, #tpu.memory_space<smem>>
      %94 = vector.broadcast %93 : f32 to vector<8x128xf32>
      %95 = arith.select %89, %94, %87 : vector<8x128xi1>, vector<8x128xf32>
      %c6_i32 = arith.constant 6 : i32
      %96 = vector.broadcast %c6_i32 : i32 to vector<8x128xi32>
      %97 = arith.cmpi eq, %45, %96 : vector<8x128xi32>
      %c12 = arith.constant 12 : index
      %98 = memref.load %arg2[%c12] : memref<64xf32, #tpu.memory_space<smem>>
      %99 = vector.broadcast %98 : f32 to vector<8x128xf32>
      %100 = arith.select %97, %99, %92 : vector<8x128xi1>, vector<8x128xf32>
      %c13 = arith.constant 13 : index
      %101 = memref.load %arg2[%c13] : memref<64xf32, #tpu.memory_space<smem>>
      %102 = vector.broadcast %101 : f32 to vector<8x128xf32>
      %103 = arith.select %97, %102, %95 : vector<8x128xi1>, vector<8x128xf32>
      %c7_i32_12 = arith.constant 7 : i32
      %104 = vector.broadcast %c7_i32_12 : i32 to vector<8x128xi32>
      %105 = arith.cmpi eq, %45, %104 : vector<8x128xi32>
      %c14 = arith.constant 14 : index
      %106 = memref.load %arg2[%c14] : memref<64xf32, #tpu.memory_space<smem>>
      %107 = vector.broadcast %106 : f32 to vector<8x128xf32>
      %108 = arith.select %105, %107, %100 : vector<8x128xi1>, vector<8x128xf32>
      %c15 = arith.constant 15 : index
      %109 = memref.load %arg2[%c15] : memref<64xf32, #tpu.memory_space<smem>>
      %110 = vector.broadcast %109 : f32 to vector<8x128xf32>
      %111 = arith.select %105, %110, %103 : vector<8x128xi1>, vector<8x128xf32>
      %c8_i32_13 = arith.constant 8 : i32
      %112 = vector.broadcast %c8_i32_13 : i32 to vector<8x128xi32>
      %113 = arith.cmpi eq, %45, %112 : vector<8x128xi32>
      %c16 = arith.constant 16 : index
      %114 = memref.load %arg2[%c16] : memref<64xf32, #tpu.memory_space<smem>>
      %115 = vector.broadcast %114 : f32 to vector<8x128xf32>
      %116 = arith.select %113, %115, %108 : vector<8x128xi1>, vector<8x128xf32>
      %c17 = arith.constant 17 : index
      %117 = memref.load %arg2[%c17] : memref<64xf32, #tpu.memory_space<smem>>
      %118 = vector.broadcast %117 : f32 to vector<8x128xf32>
      %119 = arith.select %113, %118, %111 : vector<8x128xi1>, vector<8x128xf32>
      %c9_i32 = arith.constant 9 : i32
      %120 = vector.broadcast %c9_i32 : i32 to vector<8x128xi32>
      %121 = arith.cmpi eq, %45, %120 : vector<8x128xi32>
      %c18 = arith.constant 18 : index
      %122 = memref.load %arg2[%c18] : memref<64xf32, #tpu.memory_space<smem>>
      %123 = vector.broadcast %122 : f32 to vector<8x128xf32>
      %124 = arith.select %121, %123, %116 : vector<8x128xi1>, vector<8x128xf32>
      %c19 = arith.constant 19 : index
      %125 = memref.load %arg2[%c19] : memref<64xf32, #tpu.memory_space<smem>>
      %126 = vector.broadcast %125 : f32 to vector<8x128xf32>
      %127 = arith.select %121, %126, %119 : vector<8x128xi1>, vector<8x128xf32>
      %c10_i32 = arith.constant 10 : i32
      %128 = vector.broadcast %c10_i32 : i32 to vector<8x128xi32>
      %129 = arith.cmpi eq, %45, %128 : vector<8x128xi32>
      %c20 = arith.constant 20 : index
      %130 = memref.load %arg2[%c20] : memref<64xf32, #tpu.memory_space<smem>>
      %131 = vector.broadcast %130 : f32 to vector<8x128xf32>
      %132 = arith.select %129, %131, %124 : vector<8x128xi1>, vector<8x128xf32>
      %c21 = arith.constant 21 : index
      %133 = memref.load %arg2[%c21] : memref<64xf32, #tpu.memory_space<smem>>
      %134 = vector.broadcast %133 : f32 to vector<8x128xf32>
      %135 = arith.select %129, %134, %127 : vector<8x128xi1>, vector<8x128xf32>
      %c11_i32 = arith.constant 11 : i32
      %136 = vector.broadcast %c11_i32 : i32 to vector<8x128xi32>
      %137 = arith.cmpi eq, %45, %136 : vector<8x128xi32>
      %c22 = arith.constant 22 : index
      %138 = memref.load %arg2[%c22] : memref<64xf32, #tpu.memory_space<smem>>
      %139 = vector.broadcast %138 : f32 to vector<8x128xf32>
      %140 = arith.select %137, %139, %132 : vector<8x128xi1>, vector<8x128xf32>
      %c23 = arith.constant 23 : index
      %141 = memref.load %arg2[%c23] : memref<64xf32, #tpu.memory_space<smem>>
      %142 = vector.broadcast %141 : f32 to vector<8x128xf32>
      %143 = arith.select %137, %142, %135 : vector<8x128xi1>, vector<8x128xf32>
      %c12_i32 = arith.constant 12 : i32
      %144 = vector.broadcast %c12_i32 : i32 to vector<8x128xi32>
      %145 = arith.cmpi eq, %45, %144 : vector<8x128xi32>
      %c24 = arith.constant 24 : index
      %146 = memref.load %arg2[%c24] : memref<64xf32, #tpu.memory_space<smem>>
      %147 = vector.broadcast %146 : f32 to vector<8x128xf32>
      %148 = arith.select %145, %147, %140 : vector<8x128xi1>, vector<8x128xf32>
      %c25 = arith.constant 25 : index
      %149 = memref.load %arg2[%c25] : memref<64xf32, #tpu.memory_space<smem>>
      %150 = vector.broadcast %149 : f32 to vector<8x128xf32>
      %151 = arith.select %145, %150, %143 : vector<8x128xi1>, vector<8x128xf32>
      %c13_i32 = arith.constant 13 : i32
      %152 = vector.broadcast %c13_i32 : i32 to vector<8x128xi32>
      %153 = arith.cmpi eq, %45, %152 : vector<8x128xi32>
      %c26 = arith.constant 26 : index
      %154 = memref.load %arg2[%c26] : memref<64xf32, #tpu.memory_space<smem>>
      %155 = vector.broadcast %154 : f32 to vector<8x128xf32>
      %156 = arith.select %153, %155, %148 : vector<8x128xi1>, vector<8x128xf32>
      %c27 = arith.constant 27 : index
      %157 = memref.load %arg2[%c27] : memref<64xf32, #tpu.memory_space<smem>>
      %158 = vector.broadcast %157 : f32 to vector<8x128xf32>
      %159 = arith.select %153, %158, %151 : vector<8x128xi1>, vector<8x128xf32>
      %c14_i32 = arith.constant 14 : i32
      %160 = vector.broadcast %c14_i32 : i32 to vector<8x128xi32>
      %161 = arith.cmpi eq, %45, %160 : vector<8x128xi32>
      %c28 = arith.constant 28 : index
      %162 = memref.load %arg2[%c28] : memref<64xf32, #tpu.memory_space<smem>>
      %163 = vector.broadcast %162 : f32 to vector<8x128xf32>
      %164 = arith.select %161, %163, %156 : vector<8x128xi1>, vector<8x128xf32>
      %c29 = arith.constant 29 : index
      %165 = memref.load %arg2[%c29] : memref<64xf32, #tpu.memory_space<smem>>
      %166 = vector.broadcast %165 : f32 to vector<8x128xf32>
      %167 = arith.select %161, %166, %159 : vector<8x128xi1>, vector<8x128xf32>
      %c15_i32_14 = arith.constant 15 : i32
      %168 = vector.broadcast %c15_i32_14 : i32 to vector<8x128xi32>
      %169 = arith.cmpi eq, %45, %168 : vector<8x128xi32>
      %c30 = arith.constant 30 : index
      %170 = memref.load %arg2[%c30] : memref<64xf32, #tpu.memory_space<smem>>
      %171 = vector.broadcast %170 : f32 to vector<8x128xf32>
      %172 = arith.select %169, %171, %164 : vector<8x128xi1>, vector<8x128xf32>
      %c31 = arith.constant 31 : index
      %173 = memref.load %arg2[%c31] : memref<64xf32, #tpu.memory_space<smem>>
      %174 = vector.broadcast %173 : f32 to vector<8x128xf32>
      %175 = arith.select %169, %174, %167 : vector<8x128xi1>, vector<8x128xf32>
      %c16_i32_15 = arith.constant 16 : i32
      %176 = vector.broadcast %c16_i32_15 : i32 to vector<8x128xi32>
      %177 = arith.cmpi eq, %45, %176 : vector<8x128xi32>
      %c32 = arith.constant 32 : index
      %178 = memref.load %arg2[%c32] : memref<64xf32, #tpu.memory_space<smem>>
      %179 = vector.broadcast %178 : f32 to vector<8x128xf32>
      %180 = arith.select %177, %179, %172 : vector<8x128xi1>, vector<8x128xf32>
      %c33 = arith.constant 33 : index
      %181 = memref.load %arg2[%c33] : memref<64xf32, #tpu.memory_space<smem>>
      %182 = vector.broadcast %181 : f32 to vector<8x128xf32>
      %183 = arith.select %177, %182, %175 : vector<8x128xi1>, vector<8x128xf32>
      %c17_i32 = arith.constant 17 : i32
      %184 = vector.broadcast %c17_i32 : i32 to vector<8x128xi32>
      %185 = arith.cmpi eq, %45, %184 : vector<8x128xi32>
      %c34 = arith.constant 34 : index
      %186 = memref.load %arg2[%c34] : memref<64xf32, #tpu.memory_space<smem>>
      %187 = vector.broadcast %186 : f32 to vector<8x128xf32>
      %188 = arith.select %185, %187, %180 : vector<8x128xi1>, vector<8x128xf32>
      %c35 = arith.constant 35 : index
      %189 = memref.load %arg2[%c35] : memref<64xf32, #tpu.memory_space<smem>>
      %190 = vector.broadcast %189 : f32 to vector<8x128xf32>
      %191 = arith.select %185, %190, %183 : vector<8x128xi1>, vector<8x128xf32>
      %c18_i32 = arith.constant 18 : i32
      %192 = vector.broadcast %c18_i32 : i32 to vector<8x128xi32>
      %193 = arith.cmpi eq, %45, %192 : vector<8x128xi32>
      %c36 = arith.constant 36 : index
      %194 = memref.load %arg2[%c36] : memref<64xf32, #tpu.memory_space<smem>>
      %195 = vector.broadcast %194 : f32 to vector<8x128xf32>
      %196 = arith.select %193, %195, %188 : vector<8x128xi1>, vector<8x128xf32>
      %c37 = arith.constant 37 : index
      %197 = memref.load %arg2[%c37] : memref<64xf32, #tpu.memory_space<smem>>
      %198 = vector.broadcast %197 : f32 to vector<8x128xf32>
      %199 = arith.select %193, %198, %191 : vector<8x128xi1>, vector<8x128xf32>
      %c19_i32 = arith.constant 19 : i32
      %200 = vector.broadcast %c19_i32 : i32 to vector<8x128xi32>
      %201 = arith.cmpi eq, %45, %200 : vector<8x128xi32>
      %c38 = arith.constant 38 : index
      %202 = memref.load %arg2[%c38] : memref<64xf32, #tpu.memory_space<smem>>
      %203 = vector.broadcast %202 : f32 to vector<8x128xf32>
      %204 = arith.select %201, %203, %196 : vector<8x128xi1>, vector<8x128xf32>
      %c39 = arith.constant 39 : index
      %205 = memref.load %arg2[%c39] : memref<64xf32, #tpu.memory_space<smem>>
      %206 = vector.broadcast %205 : f32 to vector<8x128xf32>
      %207 = arith.select %201, %206, %199 : vector<8x128xi1>, vector<8x128xf32>
      %c20_i32 = arith.constant 20 : i32
      %208 = vector.broadcast %c20_i32 : i32 to vector<8x128xi32>
      %209 = arith.cmpi eq, %45, %208 : vector<8x128xi32>
      %c40 = arith.constant 40 : index
      %210 = memref.load %arg2[%c40] : memref<64xf32, #tpu.memory_space<smem>>
      %211 = vector.broadcast %210 : f32 to vector<8x128xf32>
      %212 = arith.select %209, %211, %204 : vector<8x128xi1>, vector<8x128xf32>
      %c41 = arith.constant 41 : index
      %213 = memref.load %arg2[%c41] : memref<64xf32, #tpu.memory_space<smem>>
      %214 = vector.broadcast %213 : f32 to vector<8x128xf32>
      %215 = arith.select %209, %214, %207 : vector<8x128xi1>, vector<8x128xf32>
      %c21_i32 = arith.constant 21 : i32
      %216 = vector.broadcast %c21_i32 : i32 to vector<8x128xi32>
      %217 = arith.cmpi eq, %45, %216 : vector<8x128xi32>
      %c42 = arith.constant 42 : index
      %218 = memref.load %arg2[%c42] : memref<64xf32, #tpu.memory_space<smem>>
      %219 = vector.broadcast %218 : f32 to vector<8x128xf32>
      %220 = arith.select %217, %219, %212 : vector<8x128xi1>, vector<8x128xf32>
      %c43 = arith.constant 43 : index
      %221 = memref.load %arg2[%c43] : memref<64xf32, #tpu.memory_space<smem>>
      %222 = vector.broadcast %221 : f32 to vector<8x128xf32>
      %223 = arith.select %217, %222, %215 : vector<8x128xi1>, vector<8x128xf32>
      %c22_i32 = arith.constant 22 : i32
      %224 = vector.broadcast %c22_i32 : i32 to vector<8x128xi32>
      %225 = arith.cmpi eq, %45, %224 : vector<8x128xi32>
      %c44 = arith.constant 44 : index
      %226 = memref.load %arg2[%c44] : memref<64xf32, #tpu.memory_space<smem>>
      %227 = vector.broadcast %226 : f32 to vector<8x128xf32>
      %228 = arith.select %225, %227, %220 : vector<8x128xi1>, vector<8x128xf32>
      %c45 = arith.constant 45 : index
      %229 = memref.load %arg2[%c45] : memref<64xf32, #tpu.memory_space<smem>>
      %230 = vector.broadcast %229 : f32 to vector<8x128xf32>
      %231 = arith.select %225, %230, %223 : vector<8x128xi1>, vector<8x128xf32>
      %c23_i32 = arith.constant 23 : i32
      %232 = vector.broadcast %c23_i32 : i32 to vector<8x128xi32>
      %233 = arith.cmpi eq, %45, %232 : vector<8x128xi32>
      %c46 = arith.constant 46 : index
      %234 = memref.load %arg2[%c46] : memref<64xf32, #tpu.memory_space<smem>>
      %235 = vector.broadcast %234 : f32 to vector<8x128xf32>
      %236 = arith.select %233, %235, %228 : vector<8x128xi1>, vector<8x128xf32>
      %c47 = arith.constant 47 : index
      %237 = memref.load %arg2[%c47] : memref<64xf32, #tpu.memory_space<smem>>
      %238 = vector.broadcast %237 : f32 to vector<8x128xf32>
      %239 = arith.select %233, %238, %231 : vector<8x128xi1>, vector<8x128xf32>
      %c24_i32 = arith.constant 24 : i32
      %240 = vector.broadcast %c24_i32 : i32 to vector<8x128xi32>
      %241 = arith.cmpi eq, %45, %240 : vector<8x128xi32>
      %c48 = arith.constant 48 : index
      %242 = memref.load %arg2[%c48] : memref<64xf32, #tpu.memory_space<smem>>
      %243 = vector.broadcast %242 : f32 to vector<8x128xf32>
      %244 = arith.select %241, %243, %236 : vector<8x128xi1>, vector<8x128xf32>
      %c49 = arith.constant 49 : index
      %245 = memref.load %arg2[%c49] : memref<64xf32, #tpu.memory_space<smem>>
      %246 = vector.broadcast %245 : f32 to vector<8x128xf32>
      %247 = arith.select %241, %246, %239 : vector<8x128xi1>, vector<8x128xf32>
      %c25_i32 = arith.constant 25 : i32
      %248 = vector.broadcast %c25_i32 : i32 to vector<8x128xi32>
      %249 = arith.cmpi eq, %45, %248 : vector<8x128xi32>
      %c50 = arith.constant 50 : index
      %250 = memref.load %arg2[%c50] : memref<64xf32, #tpu.memory_space<smem>>
      %251 = vector.broadcast %250 : f32 to vector<8x128xf32>
      %252 = arith.select %249, %251, %244 : vector<8x128xi1>, vector<8x128xf32>
      %c51 = arith.constant 51 : index
      %253 = memref.load %arg2[%c51] : memref<64xf32, #tpu.memory_space<smem>>
      %254 = vector.broadcast %253 : f32 to vector<8x128xf32>
      %255 = arith.select %249, %254, %247 : vector<8x128xi1>, vector<8x128xf32>
      %c26_i32 = arith.constant 26 : i32
      %256 = vector.broadcast %c26_i32 : i32 to vector<8x128xi32>
      %257 = arith.cmpi eq, %45, %256 : vector<8x128xi32>
      %c52 = arith.constant 52 : index
      %258 = memref.load %arg2[%c52] : memref<64xf32, #tpu.memory_space<smem>>
      %259 = vector.broadcast %258 : f32 to vector<8x128xf32>
      %260 = arith.select %257, %259, %252 : vector<8x128xi1>, vector<8x128xf32>
      %c53 = arith.constant 53 : index
      %261 = memref.load %arg2[%c53] : memref<64xf32, #tpu.memory_space<smem>>
      %262 = vector.broadcast %261 : f32 to vector<8x128xf32>
      %263 = arith.select %257, %262, %255 : vector<8x128xi1>, vector<8x128xf32>
      %c27_i32 = arith.constant 27 : i32
      %264 = vector.broadcast %c27_i32 : i32 to vector<8x128xi32>
      %265 = arith.cmpi eq, %45, %264 : vector<8x128xi32>
      %c54 = arith.constant 54 : index
      %266 = memref.load %arg2[%c54] : memref<64xf32, #tpu.memory_space<smem>>
      %267 = vector.broadcast %266 : f32 to vector<8x128xf32>
      %268 = arith.select %265, %267, %260 : vector<8x128xi1>, vector<8x128xf32>
      %c55 = arith.constant 55 : index
      %269 = memref.load %arg2[%c55] : memref<64xf32, #tpu.memory_space<smem>>
      %270 = vector.broadcast %269 : f32 to vector<8x128xf32>
      %271 = arith.select %265, %270, %263 : vector<8x128xi1>, vector<8x128xf32>
      %c28_i32 = arith.constant 28 : i32
      %272 = vector.broadcast %c28_i32 : i32 to vector<8x128xi32>
      %273 = arith.cmpi eq, %45, %272 : vector<8x128xi32>
      %c56 = arith.constant 56 : index
      %274 = memref.load %arg2[%c56] : memref<64xf32, #tpu.memory_space<smem>>
      %275 = vector.broadcast %274 : f32 to vector<8x128xf32>
      %276 = arith.select %273, %275, %268 : vector<8x128xi1>, vector<8x128xf32>
      %c57 = arith.constant 57 : index
      %277 = memref.load %arg2[%c57] : memref<64xf32, #tpu.memory_space<smem>>
      %278 = vector.broadcast %277 : f32 to vector<8x128xf32>
      %279 = arith.select %273, %278, %271 : vector<8x128xi1>, vector<8x128xf32>
      %c29_i32 = arith.constant 29 : i32
      %280 = vector.broadcast %c29_i32 : i32 to vector<8x128xi32>
      %281 = arith.cmpi eq, %45, %280 : vector<8x128xi32>
      %c58 = arith.constant 58 : index
      %282 = memref.load %arg2[%c58] : memref<64xf32, #tpu.memory_space<smem>>
      %283 = vector.broadcast %282 : f32 to vector<8x128xf32>
      %284 = arith.select %281, %283, %276 : vector<8x128xi1>, vector<8x128xf32>
      %c59 = arith.constant 59 : index
      %285 = memref.load %arg2[%c59] : memref<64xf32, #tpu.memory_space<smem>>
      %286 = vector.broadcast %285 : f32 to vector<8x128xf32>
      %287 = arith.select %281, %286, %279 : vector<8x128xi1>, vector<8x128xf32>
      %c30_i32 = arith.constant 30 : i32
      %288 = vector.broadcast %c30_i32 : i32 to vector<8x128xi32>
      %289 = arith.cmpi eq, %45, %288 : vector<8x128xi32>
      %c60 = arith.constant 60 : index
      %290 = memref.load %arg2[%c60] : memref<64xf32, #tpu.memory_space<smem>>
      %291 = vector.broadcast %290 : f32 to vector<8x128xf32>
      %292 = arith.select %289, %291, %284 : vector<8x128xi1>, vector<8x128xf32>
      %c61 = arith.constant 61 : index
      %293 = memref.load %arg2[%c61] : memref<64xf32, #tpu.memory_space<smem>>
      %294 = vector.broadcast %293 : f32 to vector<8x128xf32>
      %295 = arith.select %289, %294, %287 : vector<8x128xi1>, vector<8x128xf32>
      %c31_i32 = arith.constant 31 : i32
      %296 = vector.broadcast %c31_i32 : i32 to vector<8x128xi32>
      %297 = arith.cmpi eq, %45, %296 : vector<8x128xi32>
      %c62 = arith.constant 62 : index
      %298 = memref.load %arg2[%c62] : memref<64xf32, #tpu.memory_space<smem>>
      %299 = vector.broadcast %298 : f32 to vector<8x128xf32>
      %300 = arith.select %297, %299, %292 : vector<8x128xi1>, vector<8x128xf32>
      %c63 = arith.constant 63 : index
      %301 = memref.load %arg2[%c63] : memref<64xf32, #tpu.memory_space<smem>>
      %302 = vector.broadcast %301 : f32 to vector<8x128xf32>
      %303 = arith.select %297, %302, %295 : vector<8x128xi1>, vector<8x128xf32>
      %c0_16 = arith.constant 0 : index
      %c0_17 = arith.constant 0 : index
      %c0_18 = arith.constant 0 : index
      %304 = vector.load %arg3[%c0_16, %c0_17, %c0_18] : memref<2x8x128xf32, #tpu.memory_space<vmem>>, vector<1x8x128xf32>
      %305 = vector.shape_cast %304 : vector<1x8x128xf32> to vector<8x128xf32>
      %306 = vector.shape_cast %300 : vector<8x128xf32> to vector<1x8x128xf32>
      tpu.vector_store %arg3[%c0_16, %c0_17, %c0_18], %306 {strides = array<i32>} : memref<2x8x128xf32, #tpu.memory_space<vmem>>, vector<1x8x128xf32>,
      %c1_19 = arith.constant 1 : index
      %c0_20 = arith.constant 0 : index
      %c0_21 = arith.constant 0 : index
      %307 = vector.load %arg3[%c1_19, %c0_20, %c0_21] : memref<2x8x128xf32, #tpu.memory_space<vmem>>, vector<1x8x128xf32>
      %308 = vector.shape_cast %307 : vector<1x8x128xf32> to vector<8x128xf32>
      %309 = vector.shape_cast %303 : vector<8x128xf32> to vector<1x8x128xf32>
      tpu.vector_store %arg3[%c1_19, %c0_20, %c0_21], %309 {strides = array<i32>} : memref<2x8x128xf32, #tpu.memory_space<vmem>>, vector<1x8x128xf32>,
    } else {
    }
    return
  }
  func.func @transform_0(%arg0: i32, %arg1: i32) -> i32 {
    %c0_i32 = arith.constant 0 : i32
    %c0_i32_0 = arith.constant 0 : i32
    return %c0_i32 : i32
  }
  func.func @transform_1(%arg0: i32, %arg1: i32) -> (i32, i32, i32) {
    %c0_i32 = arith.constant 0 : i32
    %c0_i32_0 = arith.constant 0 : i32
    return %c0_i32, %arg0, %arg1 : i32, i32, i32
  }
}

</mosaic_0001>

<bundles_post_ra>
// kernel: tpu_custom_call.1
= control target key start
LH: loop header
LB: loop body
LE: loop exit
PB: predicated region body
PF: predicated region fallthrough
CT: control target
= control target key end

     0   :  { %s781_s0 = inlined_call_operand.hbm [shape: f32[64], index: 0, kind: input, shape index: {}]   ;;  %s782_s1 = inlined_call_operand.hbm [shape: f32[2,8,128], index: 1, kind: output, shape index: {}]  }
   0x1   :  { %797 = sst [smem:[#allocation21_spill]] %s782_s1 }
   0x2   :  { %6 = vsyncpa [#allocation4], 0 }
   0x3   :  { %7 = vsyncpa [#allocation3], 0  ;;  %s394_s8 = scalar_lea.hbm %s781_s0, 16 }
   0x4   :  { %p395_p0 = scmp.ne.s32.totalorder %s781_s0, %s394_s8  ;;  %p398_p1 = scmp.lt.u32.totalorder %s394_s8, %s781_s0 }
   0x6   :  { %p400_p2 = pnand %p398_p1, %p395_p0 }
   0x8   :  { %403 = shalt.err (!%p400_p2)
}
   0x9   :  { %s430_s13 = smov [#allocation2]  }
   0xa   :  { %15 = dma.hbm_to_smem %s781_s0, 16, %s430_s13, [#allocation4]  }
   0xb   :  { %426 = dma.done.wait [#allocation4], 16  }
   0xc   :  { %427 = vsyncadd [#allocation4], 4294967280 }
   0xd   :  { %19 = sfence }
   0xe   :  { %v45_v0 = vlaneseq  ;;  %s461_s16 = sld [smem:[#allocation2]]  ;;  %s463_s0 = sld [smem:[#allocation2 + $0x1]]  ;;  %v431_v16 = vmov 0  }
   0xf   :  { %s465_s17 = sld [smem:[#allocation2 + $0x2]]  ;;  %s467_s18 = sld [smem:[#allocation2 + $0x3]] }
  0x10   :  { %v46_v1 = vshrl.u32 %v45_v0, 7  ;;  %v50_v2 = vand.u32 127, %v45_v0  ;;  %s469_s19 = sld [smem:[#allocation2 + $0x4]]  ;;  %s471_s20 = sld [smem:[#allocation2 + $0x5]] }
  0x11   :  { %s473_s21 = sld [smem:[#allocation2 + $0x6]]  ;;  %s475_s22 = sld [smem:[#allocation2 + $0x7]] }
  0x12   :  { %v53_v3 = vsub.s32 %v46_v1, %v50_v2  ;;  %s477_s23 = sld [smem:[#allocation2 + $0x8]]  ;;  %s479_s24 = sld [smem:[#allocation2 + $0x9]] }
  0x13   :  { %s481_s25 = sld [smem:[#allocation2 + $0xa]]  ;;  %s483_s26 = sld [smem:[#allocation2 + $0xb]] }
  0x14   :  { %v56_v4 = vsub.s32 0, %v53_v3  ;;  %s485_s27 = sld [smem:[#allocation2 + $0xc]]  ;;  %s487_s28 = sld [smem:[#allocation2 + $0xd]]  ;;  %vm54_vm1 = vcmp.lt.s32.totalorder %v53_v3, 0  ;;  %v77_v14 = vstv %s461_s16  ;;  %v80_v15 = vstv %s463_s0 }
  0x15   :  { %s489_s29 = sld [smem:[#allocation2 + $0xe]]  ;;  %s491_s30 = sld [smem:[#allocation2 + $0xf]]  ;;  %v55_v17 = vsel %vm54_vm1, 16, %v431_v16  ;;  %v84_v18 = vstv %s465_s17  ;;  %v87_v19 = vstv %s467_s18 }
  0x16   :  { %v457_v5 = vmin.u32 %v56_v4, %v53_v3  ;;  %s493_s2 = sld [smem:[#allocation2 + $0x10]]  ;;  %s495_s3 = sld [smem:[#allocation2 + $0x11]]  ;;  %v91_v20 = vstv %s469_s19  ;;  %v94_v22 = vstv %s471_s20 }
  0x17   :  { %s497_s4 = sld [smem:[#allocation2 + $0x12]]  ;;  %s499_s5 = sld [smem:[#allocation2 + $0x13]]  ;;  %v98_v23 = vstv %s473_s21  ;;  %v101_v24 = vstv %s475_s22 }
  0x18   :  { %vm59_vm0 = vcmp.gt.s32.totalorder %v457_v5, 8  ;;  %s501_s6 = sld [smem:[#allocation2 + $0x14]]  ;;  %s503_s7 = sld [smem:[#allocation2 + $0x15]]  ;;  %vm58_vm2 = vcmp.lt.s32.totalorder %v457_v5, 8  ;;  %v105_v25 = vstv %s477_s23  ;;  %v108_v26 = vstv %s479_s24 }
  0x19   :  { %v60_v6 = vsel %vm59_vm0, %v457_v5, 8  ;;  %798 = sst [smem:[#allocation8_spill]] %s481_s25  ;;  %s505_s8 = sld [smem:[#allocation2 + $0x16]]  ;;  %v112_v27 = vstv %s481_s25  ;;  %v115_v29 = vstv %s483_s26 }
  0x1a   :  { %v61_v7 = vcvt.s32.f32 %v60_v6  ;;  %799 = sst [smem:[#allocation9_spill]] %s485_s27  ;;  %s507_s9 = sld [smem:[#allocation2 + $0x17]]  ;;  %v119_v30 = vstv %s485_s27  ;;  %v122_v31 = vstv %s487_s28 }
  0x1b   :  { %s509_s10 = sld [smem:[#allocation2 + $0x18]]  ;;  %s511_s11 = sld [smem:[#allocation2 + $0x19]]  ;;  %v126_v32 = vstv %s489_s29  ;;  %v129_v33 = vstv %s491_s30 }
  0x1c   :  { %v63_v8 = vmul.f32 0.125, %v61_v7  ;;  %800 = sst [smem:[#allocation10_spill]] %s495_s3  ;;  %s515_s13 = sld [smem:[#allocation2 + $0x1b]]  ;;  %v133_v34 = vstv %s493_s2  ;;  %v136_v35 = vstv %s495_s3 }
  0x1d   :  { %s513_s12 = sld [smem:[#allocation2 + $0x1a]]  ;;  %s519_s14 = sld [smem:[#allocation2 + $0x1c]]  ;;  %v140_v36 = vstv %s497_s4  ;;  %v143_v37 = vstv %s499_s5 }
  0x1e   :  { %392 = vlog2.f32 %v63_v8  ;;  %801 = sst [smem:[#allocation11_spill]] %s501_s6  ;;  %s521_s15 = sld [smem:[#allocation2 + $0x1d]]  ;;  %v147_v38 = vstv %s501_s6  ;;  %v150_v40 = vstv %s503_s7 }
  0x1f   :  { %802 = sst [smem:[#allocation12_spill]] %s505_s8  ;;  %s526_s1 = sld [smem:[#allocation2 + $0x1e]]  ;;  %v154_v41 = vstv %s505_s8 }
  0x20   :  { %803 = sst [smem:[#allocation13_spill]] %s507_s9  ;;  %s533_s16 = sld [smem:[#allocation2 + $0x20]]  ;;  %v157_v42 = vstv %s507_s9 }
  0x21   :  { %s535_s0 = sld [smem:[#allocation2 + $0x21]]  ;;  %s541_s17 = sld [smem:[#allocation2 + $0x22]]  ;;  %v161_v44 = vstv %s509_s10  ;;  %v164_v45 = vstv %s511_s11 }
  0x22   :  { %804 = sst [smem:[#allocation14_spill]] %s515_s13  ;;  %s528_s13 = sld [smem:[#allocation2 + $0x1f]] }
  0x23   :  { %805 = sst [smem:[#allocation15_spill]] %s519_s14  ;;  %s546_s18 = sld [smem:[#allocation2 + $0x23]]  ;;  %v168_v46 = vstv %s513_s12  ;;  %v175_v49 = vstv %s519_s14 }
  0x24   :  { %s552_s20 = sld [smem:[#allocation2 + $0x24]]  ;;  %s811_s25 = sld [smem:[#allocation14_spill]]  ;;  %v178_v50 = vstv %s521_s15 }
  0x25   :  { %s557_s27 = sld [smem:[#allocation2 + $0x25]]  ;;  %s562_s3 = sld [smem:[#allocation2 + $0x26]]  ;;  %v182_v51 = vstv %s526_s1 }
  0x26   :  { %807 = sst [smem:[#allocation17_spill]] %s533_s16  ;;  %s570_s6 = sld [smem:[#allocation2 + $0x27]]  ;;  %v189_v53 = vstv %s533_s16 }
  0x27   :  { %808 = sst [smem:[#allocation18_spill]] %s535_s0  ;;  %s577_s8 = sld [smem:[#allocation2 + $0x28]]  ;;  %v192_v54 = vstv %s535_s0  ;;  %v196_v55 = vstv %s541_s17 }
  0x28   :  { %v393_v9 = vpop.eup %392  ;;  %806 = sst [smem:[#allocation16_spill]] %s528_s13  ;;  %v185_v52 = vstv %s528_s13  ;;  %s583_s9 = sld [smem:[#allocation2 + $0x29]] }
  0x29   :  { %v65_v10 = vmul.f32 0.6931472, %v393_v9  ;;  %809 = sst [smem:[#allocation19_spill]] %s541_s17  ;;  %s589_s14 = sld [smem:[#allocation2 + $0x2a]]  ;;  %v199_v58 = vstv %s546_s18 }
  0x2a   :  { %810 = sst [smem:[#allocation20_spill]] %s546_s18  ;;  %v171_v48 = vstv %s811_s25  ;;  %s593_s0 = sld [smem:[#allocation2 + $0x2b]]  ;;  %v203_v61 = vstv %s552_s20 }
  0x2b   :  { %v67_v11 = vmul.f32 0.36067376, %v65_v10  ;;  %s597_s17 = sld [smem:[#allocation2 + $0x2c]]  ;;  %v206_v0 = vstv %s557_s27  ;;  %s603_s18 = sld [smem:[#allocation2 + $0x2d]]  ;;  %v210_v3 = vstv %s562_s3 }
  0x2c   :  { %s611_s19 = sld [smem:[#allocation2 + $0x2e]]  ;;  %v213_v6 = vstv %s570_s6  ;;  %s619_s21 = sld [smem:[#allocation2 + $0x2f]] }
  0x2d   :  { %v68_v12 = vmul.f32 8.0, %v67_v11  ;;  %v217_v9 = vstv %s577_s8  ;;  %s627_s23 = sld [smem:[#allocation2 + $0x30]]  ;;  %s635_s24 = sld [smem:[#allocation2 + $0x31]] }
  0x2e   :  { %s643_s13 = sld [smem:[#allocation2 + $0x32]]  ;;  %s651_s29 = sld [smem:[#allocation2 + $0x33]] }
  0x2f   :  { %v385_v13 = vtrunc.f32 %v68_v12  ;;  %v220_v12 = vstv %s583_s9  ;;  %s659_s30 = sld [smem:[#allocation2 + $0x34]]  ;;  %s667_s2 = sld [smem:[#allocation2 + $0x35]] }
  0x30   :  { %s675_s5 = sld [smem:[#allocation2 + $0x36]]  ;;  %s691_s10 = sld [smem:[#allocation2 + $0x38]] }
  0x31   :  { %v386_v21 = vcvt.f32.s32 %v385_v13  ;;  %s699_s12 = sld [smem:[#allocation2 + $0x39]]  ;;  %s707_s25 = sld [smem:[#allocation2 + $0x3a]] }
  0x32   :  { %s715_s1 = sld [smem:[#allocation2 + $0x3b]]  ;;  %s723_s15 = sld [smem:[#allocation2 + $0x3c]] }
  0x33   :  { %v70_v28 = vadd.s32 8, %v386_v21  ;;  %v231_v21 = vstv %s597_s17  ;;  %s683_s17 = sld [smem:[#allocation2 + $0x37]]  ;;  %s739_s20 = sld [smem:[#allocation2 + $0x3e]] }
  0x34   :  { %s747_s27 = sld [smem:[#allocation2 + $0x3f]]  ;;  %s432_s3 = smov [#allocation5]  }
  0x35   :  { %vm71_vm3 = vcmp.lt.s32.totalorder %v70_v28, 15  ;;  %s307_s6 = sshll.u32 %s432_s3, 4  ;;  %s308_s6 = int_to_ptr.vmem [resolvable:$true] %s307_s6 }
  0x36   :  { %v72_v39 = vsel %vm71_vm3, %v70_v28, 15  ;;  %s404_s8 = scalar_lea.vmem %s308_s6, 256  ;;  %p409_p4 = scmp.lt.s32.totalorder %s308_s6, %s308_s6 }
  0x37   :  { %v73_v43 = vsel %vm58_vm2, %v457_v5, %v72_v39  ;;  %v252_v39 = vstv %s643_s13  ;;  %p405_p3 = scmp.ne.s32.totalorder %s308_s6, %s404_s8  ;;  %p410_p5 = scmp.lt.s32.totalorder %s404_s8, %s404_s8 }
  0x38   :  { %v572_v47 = vadd.s32 %v73_v43, %v55_v17 }
  0x39   :  { %p411_p6 = por %p410_p5, %p409_p4 }
  0x3a   :  { %vm75_vm4 = vcmp.eq.s32.totalorder %v572_v47, 0  ;;  %vm82_vm5 = vcmp.eq.s32.totalorder %v572_v47, 1  ;;  %vm89_vm6 = vcmp.eq.s32.totalorder %v572_v47, 2  ;;  %vm96_vm7 = vcmp.eq.s32.totalorder %v572_v47, 3 }
  0x3b   :  { %v78_v56 = vsel %vm75_vm4, %v77_v14, 0.0  ;;  %v81_v57 = vsel %vm75_vm4, %v80_v15, 0.0  ;;  %vm103_vm8 = vcmp.eq.s32.totalorder %v572_v47, 4  ;;  %vm110_vm9 = vcmp.eq.s32.totalorder %v572_v47, 5  ;;  %p412_p7 = pnand %p411_p6, %p405_p3 }
  0x3c   :  { %v85_v59 = vsel %vm82_vm5, %v84_v18, %v78_v56  ;;  %v88_v60 = vsel %vm82_vm5, %v87_v19, %v81_v57  ;;  %vm117_vm10 = vcmp.eq.s32.totalorder %v572_v47, 6  ;;  %vm124_vm11 = vcmp.eq.s32.totalorder %v572_v47, 7 }
  0x3d   :  { %v92_v62 = vsel %vm89_vm6, %v91_v20, %v85_v59  ;;  %v95_v63 = vsel %vm89_vm6, %v94_v22, %v88_v60  ;;  %vm131_vm12 = vcmp.eq.s32.totalorder %v572_v47, 8  ;;  %vm138_vm13 = vcmp.eq.s32.totalorder %v572_v47, 9 }
  0x3e   :  { %v99_v1 = vsel %vm96_vm7, %v98_v23, %v92_v62  ;;  %v102_v2 = vsel %vm96_vm7, %v101_v24, %v95_v63  ;;  %vm145_vm14 = vcmp.eq.s32.totalorder %v572_v47, 10  ;;  %v224_v15 = vstv %s589_s14 }
  0x3f   :  { %v106_v4 = vsel %vm103_vm8, %v105_v25, %v99_v1  ;;  %v109_v5 = vsel %vm103_vm8, %v108_v26, %v102_v2  ;;  %vm152_vm15 = vcmp.eq.s32.totalorder %v572_v47, 11  ;;  %v227_v18 = vstv %s593_s0 }
  0x40   :  { %v113_v7 = vsel %vm110_vm9, %v112_v27, %v106_v4  ;;  %v116_v8 = vsel %vm110_vm9, %v115_v29, %v109_v5  ;;  %vm159_vm0 = vcmp.eq.s32.totalorder %v572_v47, 12  ;;  %vm166_vm1 = vcmp.eq.s32.totalorder %v572_v47, 13 }
  0x41   :  { %v120_v10 = vsel %vm117_vm10, %v119_v30, %v113_v7  ;;  %v123_v11 = vsel %vm117_vm10, %v122_v31, %v116_v8  ;;  %v234_v24 = vstv %s603_s18  ;;  %vm173_vm2 = vcmp.eq.s32.totalorder %v572_v47, 14 }
  0x42   :  { %v127_v13 = vsel %vm124_vm11, %v126_v32, %v120_v10  ;;  %v130_v14 = vsel %vm124_vm11, %v129_v33, %v123_v11  ;;  %v238_v27 = vstv %s611_s19  ;;  %vm180_vm3 = vcmp.eq.s32.totalorder %v572_v47, 15 }
  0x43   :  { %v134_v16 = vsel %vm131_vm12, %v133_v34, %v127_v13  ;;  %v137_v17 = vsel %vm131_vm12, %v136_v35, %v130_v14  ;;  %v241_v30 = vstv %s619_s21  ;;  %vm187_vm4 = vcmp.eq.s32.totalorder %v572_v47, 16  ;;  %s731_s21 = sld [smem:[#allocation2 + $0x3d]] }
  0x44   :  { %v141_v19 = vsel %vm138_vm13, %v140_v36, %v134_v16  ;;  %v144_v20 = vsel %vm138_vm13, %v143_v37, %v137_v17  ;;  %v245_v33 = vstv %s627_s23  ;;  %vm194_vm5 = vcmp.eq.s32.totalorder %v572_v47, 17 }
  0x45   :  { %v148_v22 = vsel %vm145_vm14, %v147_v38, %v141_v19  ;;  %v151_v23 = vsel %vm145_vm14, %v150_v40, %v144_v20  ;;  %v248_v36 = vstv %s635_s24  ;;  %vm201_vm6 = vcmp.eq.s32.totalorder %v572_v47, 18 }
  0x46   :  { %v155_v25 = vsel %vm152_vm15, %v154_v41, %v148_v22  ;;  %v158_v26 = vsel %vm152_vm15, %v157_v42, %v151_v23  ;;  %vm208_vm7 = vcmp.eq.s32.totalorder %v572_v47, 19  ;;  %v255_v42 = vstv %s651_s29 }
  0x47   :  { %v162_v28 = vsel %vm159_vm0, %v161_v44, %v155_v25  ;;  %v165_v29 = vsel %vm159_vm0, %v164_v45, %v158_v26  ;;  %vm215_vm8 = vcmp.eq.s32.totalorder %v572_v47, 20  ;;  %v259_v45 = vstv %s659_s30 }
  0x48   :  { %v169_v31 = vsel %vm166_vm1, %v168_v46, %v162_v28  ;;  %v172_v32 = vsel %vm166_vm1, %v171_v48, %v165_v29  ;;  %vm222_vm9 = vcmp.eq.s32.totalorder %v572_v47, 21  ;;  %vm229_vm10 = vcmp.eq.s32.totalorder %v572_v47, 22 }
  0x49   :  { %v176_v34 = vsel %vm173_vm2, %v175_v49, %v169_v31  ;;  %v179_v35 = vsel %vm173_vm2, %v178_v50, %v172_v32  ;;  %v262_v49 = vstv %s667_s2  ;;  %vm236_vm11 = vcmp.eq.s32.totalorder %v572_v47, 23 }
  0x4a   :  { %v183_v37 = vsel %vm180_vm3, %v182_v51, %v176_v34  ;;  %v186_v38 = vsel %vm180_vm3, %v185_v52, %v179_v35  ;;  %v266_v52 = vstv %s675_s5  ;;  %vm243_vm12 = vcmp.eq.s32.totalorder %v572_v47, 24 }
  0x4b   :  { %v190_v40 = vsel %vm187_vm4, %v189_v53, %v183_v37  ;;  %v193_v41 = vsel %vm187_vm4, %v192_v54, %v186_v38  ;;  %vm250_vm13 = vcmp.eq.s32.totalorder %v572_v47, 25  ;;  %vm257_vm14 = vcmp.eq.s32.totalorder %v572_v47, 26 }
  0x4c   :  { %v197_v43 = vsel %vm194_vm5, %v196_v55, %v190_v40  ;;  %v200_v44 = vsel %vm194_vm5, %v199_v58, %v193_v41  ;;  %v269_v55 = vstv %s683_s17  ;;  %v273_v58 = vstv %s691_s10 }
  0x4d   :  { %v204_v46 = vsel %vm201_vm6, %v203_v61, %v197_v43  ;;  %v207_v48 = vsel %vm201_vm6, %v206_v0, %v200_v44  ;;  %v276_v61 = vstv %s699_s12  ;;  %v280_v0 = vstv %s707_s25 }
  0x4e   :  { %v211_v50 = vsel %vm208_vm7, %v210_v3, %v204_v46  ;;  %v214_v51 = vsel %vm208_vm7, %v213_v6, %v207_v48  ;;  %vm264_vm15 = vcmp.eq.s32.totalorder %v572_v47, 27  ;;  %v283_v3 = vstv %s715_s1 }
  0x4f   :  { %v218_v53 = vsel %vm215_vm8, %v217_v9, %v211_v50  ;;  %v221_v54 = vsel %vm215_vm8, %v220_v12, %v214_v51  ;;  %vm271_vm0 = vcmp.eq.s32.totalorder %v572_v47, 28  ;;  %v287_v6 = vstv %s723_s15 }
  0x50   :  { %v225_v56 = vsel %vm222_vm9, %v224_v15, %v218_v53  ;;  %v228_v57 = vsel %vm222_vm9, %v227_v18, %v221_v54  ;;  %vm278_vm1 = vcmp.eq.s32.totalorder %v572_v47, 29  ;;  %v290_v9 = vstv %s731_s21 }
  0x51   :  { %v232_v59 = vsel %vm229_vm10, %v231_v21, %v225_v56  ;;  %v235_v60 = vsel %vm229_vm10, %v234_v24, %v228_v57  ;;  %vm285_vm2 = vcmp.eq.s32.totalorder %v572_v47, 30  ;;  %v294_v12 = vstv %s739_s20 }
  0x52   :  { %v239_v62 = vsel %vm236_vm11, %v238_v27, %v232_v59  ;;  %v242_v63 = vsel %vm236_vm11, %v241_v30, %v235_v60  ;;  %vm292_vm3 = vcmp.eq.s32.totalorder %v572_v47, 31  ;;  %v297_v15 = vstv %s747_s27 }
  0x53   :  { %v246_v1 = vsel %vm243_vm12, %v245_v33, %v239_v62  ;;  %v249_v2 = vsel %vm243_vm12, %v248_v36, %v242_v63 }
  0x54   :  { %v253_v4 = vsel %vm250_vm13, %v252_v39, %v246_v1  ;;  %v256_v5 = vsel %vm250_vm13, %v255_v42, %v249_v2 }
  0x55   :  { %v260_v7 = vsel %vm257_vm14, %v259_v45, %v253_v4  ;;  %v263_v8 = vsel %vm257_vm14, %v262_v49, %v256_v5 }
  0x56   :  { %v267_v10 = vsel %vm264_vm15, %v266_v52, %v260_v7  ;;  %v270_v11 = vsel %vm264_vm15, %v269_v55, %v263_v8 }
  0x57   :  { %v274_v13 = vsel %vm271_vm0, %v273_v58, %v267_v10  ;;  %v277_v14 = vsel %vm271_vm0, %v276_v61, %v270_v11 }
  0x58   :  { %v281_v16 = vsel %vm278_vm1, %v280_v0, %v274_v13  ;;  %v284_v17 = vsel %vm278_vm1, %v283_v3, %v277_v14 }
  0x59   :  { %v288_v18 = vsel %vm285_vm2, %v287_v6, %v281_v16  ;;  %v291_v19 = vsel %vm285_vm2, %v290_v9, %v284_v17 }
  0x5a   :  { %v295_v20 = vsel %vm292_vm3, %v294_v12, %v288_v18  ;;  %v298_v21 = vsel %vm292_vm3, %v297_v15, %v291_v19 }
  0x5b   :  { %299 = vst [vmem:[#allocation5] sm:$0xff] %v295_v20  ;;  %301 = vst [vmem:[#allocation5 + $0x8] sm:$0xff] %v298_v21 }
  0x5c   :  { %415 = shalt.err (!%p412_p7)
}
  0x5d   :  { %s824_s0 = sld [smem:[#allocation21_spill]] }
  0x63   :  { %s416_s23 = scalar_lea.hbm %s824_s0, 256 }
  0x64   :  { %p417_p8 = scmp.ne.s32.totalorder %s824_s0, %s416_s23  ;;  %p420_p9 = scmp.lt.u32.totalorder %s416_s23, %s824_s0 }
  0x66   :  { %p422_p10 = pnand %p420_p9, %p417_p8 }
  0x68   :  { %425 = shalt.err (!%p422_p10)
}
  0x69   :  { %s433_s16 = smov 128   ;;  %s434_s29 = smov 8  }
  0x6a   :  { %313 = dma.vmem_to_hbm [thread:$0]  %s308_s6, 256, %s824_s0, [#allocation3], %s433_s16, %s433_s16, %s434_s29  }
  0x6b   :  { %428 = dma.done.wait [#allocation3], 256  }
  0x6c   :  { %429 = vsyncadd [#allocation3], 4294967040 }
  0x6d   :  { %317 = vsyncpa [#allocation3], 1 }
  0x6e   :  { %318 = vsyncpa [#allocation4], 1 }

</bundles_post_ra>
